<compile_context>
chip_gen: v6e
topology: v6e:2x2x1
jax: 0.10.0
libtpu: 0.0.40
codegen_flags: <defaults>
</compile_context>

<pallas_src>
import math
import numpy as np
import jax
import jax.numpy as jnp
from jax.experimental import pallas as pl
from jax.experimental.pallas import tpu as pltpu


def _round_up(x, m):
    return ((x + m - 1) // m) * m


def _lcm(a, b):
    return a * b // math.gcd(a, b)


# ----------------------------- Pallas kernel --------------------------------
def cqt_strided_conv(slab, wt, *, TQ, OVQ, D_ext, num_tiles):
    """Strided-conv-as-matmul over a lane-dense (128-sample-row) signal slab.

    slab : (B, n_srows, 128) f32   slab[b, s, u] = sig[b, s*128 + u]
    wt   : (P*C_pad, K_ext)  f32   phase-folded weights:
                                   wt[p*C_pad + c, p*hop + k] = W[k, c]
    out  : (B, P*C_pad, LQ_pad) f32
           out[b, p*C_pad + c, q] = sum_k W[k, c] * sig[b, (q*P + p)*hop + k]
    """
    B, n_srows, lanes = slab.shape
    PC, K_ext = wt.shape
    assert lanes == 128 and K_ext == D_ext * 128
    assert TQ % 128 == 0 and TQ % OVQ == 0 and OVQ % 8 == 0
    assert OVQ >= D_ext - 1
    assert n_srows >= num_tiles * TQ + OVQ
    LQ_pad = num_tiles * TQ

    def kernel(cur_ref, ov_ref, w_ref, o_ref, f_ref):
        # Stage this tile's contiguous slab rows (both copies 8/128-aligned).
        f_ref[0:TQ, 0:128] = cur_ref[...]
        f_ref[TQ:TQ + OVQ, 0:128] = ov_ref[...]
        # Frame tile: f[q, d*128 + u] = sig[(q0 + q + d)*128 + u].
        # Column block d>0 is the staged slab shifted up by d rows: one small
        # sublane-shifted self-copy per extra 128-tap block (D_ext-1 total).
        for d in range(1, D_ext):
            f_ref[0:TQ, d * 128:(d + 1) * 128] = f_ref[d:TQ + d, 0:128]
        # One fused MXU contraction over K_ext per tile; frames land on the
        # lane axis of the output block (lane-dense, unmasked stores).
        o_ref[...] = jax.lax.dot_general(
            w_ref[...], f_ref[0:TQ, :],
            dimension_numbers=(((1,), (1,)), ((), ())),
            preferred_element_type=jnp.float32)

    return pl.pallas_call(
        kernel,
        out_shape=jax.ShapeDtypeStruct((B, PC, LQ_pad), jnp.float32),
        grid=(B, num_tiles),
        in_specs=[
            # current tile's slab rows [i*TQ, (i+1)*TQ)
            pl.BlockSpec((None, TQ, 128), lambda b, i: (b, i, 0)),
            # small lookahead block: rows [(i+1)*TQ, (i+1)*TQ + OVQ) (same array)
            pl.BlockSpec((None, OVQ, 128),
                         lambda b, i: (b, (i + 1) * (TQ // OVQ), 0)),
            # full (small) phase-folded weight bank, resident every step
            pl.BlockSpec((PC, K_ext), lambda b, i: (0, 0)),
        ],
        out_specs=pl.BlockSpec((None, PC, TQ), lambda b, i: (b, 0, i)),
        scratch_shapes=[pltpu.VMEM((TQ + OVQ, K_ext), jnp.float32)],
        compiler_params=pltpu.CompilerParams(
            dimension_semantics=("parallel", "parallel"),
            vmem_limit_bytes=32 * 1024 * 1024),
    )(slab, slab, wt)


# ---------------------------- CQT construction ------------------------------
class CQTPallas:
    """JAX/Pallas re-implementation of the PyTorch CQT module.

    The constant-Q filter bank is synthesized deterministically in-script
    (hann-windowed complex exponentials with the same support structure as
    librosa.filters.constant_q).  Scaled-down defaults keep the demo small.
    """

    def __init__(self, sr=2000, fmin=100.0, n_bins=12, bins_per_octave=4,
                 filter_scale=1.0, hop_length=32):
        self.sr = sr
        self.fmin = fmin
        self.n_bins = n_bins
        self.bins_per_octave = bins_per_octave
        self.filter_scale = filter_scale
        self.hop_length = hop_length
        assert 128 % hop_length == 0, \
            "Pallas path assumes hop_length divides the 128-lane width"

        # ---- constant-Q filter lengths / synthetic complex filters ----
        Q = filter_scale / (2.0 ** (1.0 / bins_per_octave) - 1.0)
        freqs = fmin * 2.0 ** (np.arange(n_bins) / bins_per_octave)
        lengths = np.ceil(Q * sr / freqs).astype(int)
        N = 2 ** int(math.ceil(np.log2(lengths.max())))  # filter_length (pad_fft)
        filt = np.zeros((n_bins, N), dtype=np.complex128)
        for i, (f, l) in enumerate(zip(freqs, lengths)):
            n = np.arange(l) - l // 2
            win = np.hanning(l)
            sig = win * np.exp(2j * np.pi * f * n / sr)
            sig = sig / (np.linalg.norm(sig) + 1e-12)
            start = (N - l) // 2
            filt[i, start:start + l] = sig
        self.cqt_filter_lengths = lengths
        self.filter_length = N

        # ---- grouping logic (identical to the PyTorch __init__) ----
        self.conv_kernel_sizes = []
        self.conv_index_ranges = []
        current_kernel_size = None
        last_change_index = 0
        for i, l in enumerate(lengths):
            kernel_size = 2 ** int(math.ceil(np.log2(l)))
            if current_kernel_size is not None and kernel_size >= current_kernel_size:
                continue
            self.conv_kernel_sizes.append(kernel_size)
            current_kernel_size = kernel_size
            if i != 0:
                self.conv_index_ranges.append(range(last_change_index, i))
            last_change_index = i
        self.conv_index_ranges.append(range(last_change_index, len(lengths)))

        # ---- per-group conv weights (as in nn.Conv1d), fp32 ----
        self.group_weights = []  # each: (2*g_i, K_i) == cat([real, imag], dim=0)
        for i, size in enumerate(self.conv_kernel_sizes):
            rng = self.conv_index_ranges[i]
            offset = (N - size) // 2
            if offset > 0:
                this = filt[rng.start:rng.stop, offset:-offset]
            else:
                this = filt[rng.start:rng.stop, :]
            w = np.concatenate([np.real(this), np.imag(this)], axis=0).astype(np.float32)
            self.group_weights.append(w)

        # ---- fused weight (K0, 2*n_bins): real bins then imag bins ----
        K0 = self.conv_kernel_sizes[0]
        W_real = np.zeros((n_bins, K0), np.float32)
        W_imag = np.zeros((n_bins, K0), np.float32)
        for i, size in enumerate(self.conv_kernel_sizes):
            rng = self.conv_index_ranges[i]
            off = (K0 - size) // 2
            g = rng.stop - rng.start
            w = self.group_weights[i]
            W_real[rng.start:rng.stop, off:off + size] = w[:g]
            W_imag[rng.start:rng.stop, off:off + size] = w[g:]
        W_fused = np.concatenate([W_real, W_imag], axis=0).T            # (K0, 2n)

        # ---- phase-folded, lane-dense weight bank (built ONCE) ----
        # For frame l = q*P + p (P = 128/hop), the frame starts at sample
        # q*128 + p*hop, so phase p's taps live at column offset p*hop of a
        # shared (TQ, K_ext) frame tile whose rows are 128-sample slab rows.
        self.K0 = K0
        self.R_eff = -(-K0 // hop_length)
        self.K_eff = self.R_eff * hop_length                  # K0 rounded to hop
        self.P = 128 // hop_length                            # phases per slab row
        self.C_pad = _round_up(2 * n_bins, 8)                 # sublane-aligned chans
        self.K_ext = _round_up((self.P - 1) * hop_length + self.K_eff, 128)
        self.D_ext = self.K_ext // 128                        # 128-tap column blocks
        Wt = np.zeros((self.P * self.C_pad, self.K_ext), np.float32)
        for p in range(self.P):
            Wt[p * self.C_pad: p * self.C_pad + 2 * n_bins,
               p * hop_length: p * hop_length + K0] = W_fused.T
        self.Wt = jnp.asarray(Wt)                             # (P*C_pad, K_ext)

    # -------- forward (Pallas hot path) --------
    def __call__(self, x):
        # x: (B, 1, T) float32   (PyTorch NCW layout)
        B, _, T = x.shape
        hop, K0 = self.hop_length, self.K0
        n_bins, P, C_pad = self.n_bins, self.P, self.C_pad
        D_ext = self.D_ext

        L = (T - K0 - 1) // hop + 1          # matches the module's x[:, :, :-1] crop
        assert L >= 1, "input too short for the largest CQT kernel"

        # Tile sizing: TQ slab rows (=> TM = TQ*P frames) per grid step.
        LQ = -(-L // P)                                   # rows covering L frames
        OVQ = _round_up(max(D_ext - 1, 1), 8)             # lookahead rows
        align = _lcm(128, OVQ)
        TQ_cap = _round_up(max(128, 2048 // P), align)    # ~2K frames per tile
        TQ = min(_round_up(LQ, align), TQ_cap)            # small inputs -> TQ=128
        num_tiles = -(-LQ // TQ)
        LQ_pad = num_tiles * TQ
        n_srows = num_tiles * TQ + OVQ                    # pad only OVQ extra rows
        need = n_srows * 128

        # Lane-dense 128-sample-row view of the signal (single pad, no im2col).
        sig = x[:, 0, :].astype(jnp.float32)
        # TODO(synk): bf16 signal stream (f32 accumulate) once tolerance allows.
        if need > T:
            sig = jnp.pad(sig, ((0, 0), (0, need - T)))
        else:
            sig = sig[:, :need]
        slab = sig.reshape(B, n_srows, 128)

        out = cqt_strided_conv(slab, self.Wt, TQ=TQ, OVQ=OVQ, D_ext=D_ext,
                               num_tiles=num_tiles)       # (B, P*C_pad, LQ_pad)

        # Wrapper-side phase de-interleave of the small result:
        #   out[b, p*C_pad + c, q]  ->  final[b, c, q*P + p]
        out = out.reshape(B, P, C_pad, LQ_pad)
        out = jnp.transpose(out, (0, 2, 3, 1)).reshape(B, C_pad, LQ_pad * P)
        out = out[:, :2 * n_bins, :L]                     # (B, 2*n_bins, L)
        real = out[:, :n_bins, :]
        imag = out[:, n_bins:, :]
        return jnp.stack([real, imag], axis=3)            # (B, n_bins, L, 2)

    # -------- pure-JAX reference mirroring the PyTorch forward loop --------
    def reference(self, x):
        B, _, T = x.shape
        K0, hop = self.conv_kernel_sizes[0], self.hop_length
        real_list, imag_list = [], []
        for i, K in enumerate(self.conv_kernel_sizes):
            offset = (K0 - K) // 2
            xs = x[:, 0, offset: T - (offset + 1)]               # x[:, :, off:-(off+1)]
            Ti = xs.shape[1]
            L = (Ti - K) // hop + 1
            idx = (jnp.arange(L) * hop)[:, None] + jnp.arange(K)[None, :]
            fr = xs[:, idx]                                      # (B, L, K)
            w = jnp.asarray(self.group_weights[i])               # (2g, K)
            res = jnp.einsum('blk,ck->bcl', fr, w)               # strided conv1d
            g = w.shape[0] // 2
            real_list.append(res[:, :g])
            imag_list.append(res[:, g:])
        real = jnp.concatenate(real_list, axis=1)
        imag = jnp.concatenate(imag_list, axis=1)
        return jnp.stack([real, imag], axis=3)


# --------------------------------- main --------------------------------------
if __name__ == "__main__":
    key = jax.random.PRNGKey(0)
    B, T = 2, 1024
    x = jax.random.normal(key, (B, 1, T), dtype=jnp.float32)

    cqt = CQTPallas(sr=2000, fmin=100.0, n_bins=12, bins_per_octave=4,
                    filter_scale=1.0, hop_length=32)

    out = jax.block_until_ready(cqt(x))
    ref = jax.block_until_ready(cqt.reference(x))
    assert out.shape == ref.shape, (out.shape, ref.shape)
    assert np.allclose(np.asarray(out), np.asarray(ref), atol=1e-4, rtol=1e-4)

    print("KERNEL_OK")
</pallas_src>

<mosaic_0001>
module attributes {stable_mosaic.version = 11 : i64} {
  func.func @kernel(%arg0: i32, %arg1: i32, %arg2: memref<1x128x128xf32, #tpu.memory_space<vmem>>, %arg3: memref<1x8x128xf32, #tpu.memory_space<vmem>>, %arg4: memref<96x256xf32, #tpu.memory_space<vmem>>, %arg5: memref<1x96x128xf32, #tpu.memory_space<vmem>>, %arg6: memref<136x256xf32, #tpu.memory_space<vmem>>) attributes {dimension_semantics = [#tpu.dimension_semantics<parallel>, #tpu.dimension_semantics<parallel>], iteration_bounds = array<i64: 2, 1>, scalar_prefetch = 0 : i64, scratch_operands = 1 : i64, tpu.core_type = #tpu.core_type<tc>, window_params = [{transform_indices = @transform_0, window_bounds = array<i64: 1, 128, 128>}, {transform_indices = @transform_1, window_bounds = array<i64: 1, 8, 128>}, {pipeline_mode = #tpu.pipeline_mode<synchronous>, transform_indices = @transform_2, window_bounds = array<i64: 96, 256>}, {transform_indices = @transform_3, window_bounds = array<i64: 1, 96, 128>}]} {
    %c0 = arith.constant 0 : index
    %c0_0 = arith.constant 0 : index
    %c0_1 = arith.constant 0 : index
    %0 = vector.load %arg2[%c0, %c0_0, %c0_1] : memref<1x128x128xf32, #tpu.memory_space<vmem>>, vector<1x128x128xf32>
    %1 = vector.shape_cast %0 : vector<1x128x128xf32> to vector<128x128xf32>
    %c0_2 = arith.constant 0 : index
    %c0_3 = arith.constant 0 : index
    %2 = vector.load %arg6[%c0_2, %c0_3] : memref<136x256xf32, #tpu.memory_space<vmem>>, vector<128x128xf32>
    tpu.vector_store %arg6[%c0_2, %c0_3], %1 {strides = array<i32>} : memref<136x256xf32, #tpu.memory_space<vmem>>, vector<128x128xf32>,
    %c0_4 = arith.constant 0 : index
    %c0_5 = arith.constant 0 : index
    %c0_6 = arith.constant 0 : index
    %3 = vector.load %arg3[%c0_4, %c0_5, %c0_6] : memref<1x8x128xf32, #tpu.memory_space<vmem>>, vector<1x8x128xf32>
    %4 = vector.shape_cast %3 : vector<1x8x128xf32> to vector<8x128xf32>
    %c128 = arith.constant 128 : index
    %c0_7 = arith.constant 0 : index
    %5 = vector.load %arg6[%c128, %c0_7] : memref<136x256xf32, #tpu.memory_space<vmem>>, vector<8x128xf32>
    tpu.vector_store %arg6[%c128, %c0_7], %4 {strides = array<i32>} : memref<136x256xf32, #tpu.memory_space<vmem>>, vector<8x128xf32>,
    %c1 = arith.constant 1 : index
    %c0_8 = arith.constant 0 : index
    %6 = vector.load %arg6[%c1, %c0_8] : memref<136x256xf32, #tpu.memory_space<vmem>>, vector<128x128xf32>
    %c0_9 = arith.constant 0 : index
    %c128_10 = arith.constant 128 : index
    %7 = vector.load %arg6[%c0_9, %c128_10] : memref<136x256xf32, #tpu.memory_space<vmem>>, vector<128x128xf32>
    tpu.vector_store %arg6[%c0_9, %c128_10], %6 {strides = array<i32>} : memref<136x256xf32, #tpu.memory_space<vmem>>, vector<128x128xf32>,
    %c0_11 = arith.constant 0 : index
    %c0_12 = arith.constant 0 : index
    %8 = vector.load %arg4[%c0_11, %c0_12] : memref<96x256xf32, #tpu.memory_space<vmem>>, vector<96x256xf32>
    %c0_13 = arith.constant 0 : index
    %c0_14 = arith.constant 0 : index
    %9 = vector.load %arg6[%c0_13, %c0_14] : memref<136x256xf32, #tpu.memory_space<vmem>>, vector<128x256xf32>
    %cst = arith.constant dense<0.000000e+00> : vector<96x128xf32>
    %10 = tpu.matmul %8, %9, %cst {dimension_numbers = #tpu.dot_dimension_numbers<[1], [1], [0], [0], [0, 0, 1, 0], [], []>} : vector<96x256xf32>, vector<128x256xf32>, vector<96x128xf32> -> vector<96x128xf32>
    %c0_15 = arith.constant 0 : index
    %c0_16 = arith.constant 0 : index
    %c0_17 = arith.constant 0 : index
    %11 = vector.load %arg5[%c0_15, %c0_16, %c0_17] : memref<1x96x128xf32, #tpu.memory_space<vmem>>, vector<1x96x128xf32>
    %12 = vector.shape_cast %11 : vector<1x96x128xf32> to vector<96x128xf32>
    %13 = vector.shape_cast %10 : vector<96x128xf32> to vector<1x96x128xf32>
    tpu.vector_store %arg5[%c0_15, %c0_16, %c0_17], %13 {strides = array<i32>} : memref<1x96x128xf32, #tpu.memory_space<vmem>>, vector<1x96x128xf32>,
    return
  }
  func.func @transform_0(%arg0: i32, %arg1: i32) -> (i32, i32, i32) {
    %c0_i32 = arith.constant 0 : i32
    %c0_i32_0 = arith.constant 0 : i32
    return %arg0, %arg1, %c0_i32 : i32, i32, i32
  }
  func.func @transform_1(%arg0: i32, %arg1: i32) -> (i32, i32, i32) {
    %c1_i32 = arith.constant 1 : i32
    %0 = arith.addi %arg1, %c1_i32 : i32
    %c16_i32 = arith.constant 16 : i32
    %1 = arith.muli %0, %c16_i32 : i32
    %c0_i32 = arith.constant 0 : i32
    %c0_i32_0 = arith.constant 0 : i32
    return %arg0, %1, %c0_i32 : i32, i32, i32
  }
  func.func @transform_2(%arg0: i32, %arg1: i32) -> (i32, i32) {
    %c0_i32 = arith.constant 0 : i32
    %c0_i32_0 = arith.constant 0 : i32
    %c0_i32_1 = arith.constant 0 : i32
    return %c0_i32, %c0_i32_0 : i32, i32
  }
  func.func @transform_3(%arg0: i32, %arg1: i32) -> (i32, i32, i32) {
    %c0_i32 = arith.constant 0 : i32
    %c0_i32_0 = arith.constant 0 : i32
    return %arg0, %c0_i32, %arg1 : i32, i32, i32
  }
}

</mosaic_0001>

<bundles_post_ra>
// kernel: tpu_custom_call.1
= control target key start
LH: loop header
LB: loop body
LE: loop exit
PB: predicated region body
PF: predicated region fallthrough
CT: control target
= control target key end

     0   :  { %s1401_s0 = inlined_call_operand.hbm [shape: f32[2,136,128], index: 0, kind: input, shape index: {}]   ;;  %s1402_s1 = inlined_call_operand.hbm [shape: f32[2,136,128], index: 1, kind: input, shape index: {}]   ;;  %s1403_s2 = inlined_call_operand.hbm [shape: f32[96,256], index: 2, kind: input, shape index: {}]   ;;  %s1404_s3 = inlined_call_operand.hbm [shape: f32[2,96,128], index: 3, kind: output, shape index: {}]  }
   0x1   :  { %1409 = sst [smem:[#allocation18_spill]] %s1401_s0 }
   0x2   :  { %1410 = sst [smem:[#allocation19_spill]] %s1403_s2 }
   0x3   :  { %8 = vsyncpa [#allocation4], 0 }
   0x4   :  { %10 = vsyncpa [#allocation4 + $0x1], 0 }
   0x5   :  { %11 = vsyncpa [#allocation7], 0 }
   0x6   :  { %13 = vsyncpa [#allocation7 + $0x1], 0 }
   0x7   :  { %14 = vsyncpa [#allocation5], 0 }
   0x8   :  { %16 = vsyncpa [#allocation5 + $0x1], 0  ;;  %s1083_s12 = smov 0   ;;  %s1085_s13 = smov 0  }
   0x9   :  { %s1087_s14 = smov 0   ;;  %s1089_s15 = smov 0  }
   0xa   :  { %s1091_s16 = smov 0   ;;  %s1093_s17 = smov 0  }
   0xb LB: > { %1411 = sst [smem:[#allocation14_spill]] %s1039_s14  ;;  %s1114_s18 = sadd.s32 4294967295, %s1051_s17   ;;  %s1051_s17 = sphi %s1093_s17, %s22_s17   ;;  %s1047_s16 = sphi %s1091_s16, %s1432_s16   ;;  %s1043_s15 = sphi %s1089_s15, %s1431_s15   ;;  %s1039_s14 = sphi %s1087_s14, %s1427_s14   ;;  %s1035_s13 = sphi %s1085_s13, %s1430_s13   ;;  %s1031_s12 = sphi %s1083_s12, %s1429_s12  }
   0xc   : > { %1412 = sst [smem:[#allocation15_spill]] %s1051_s17  ;;  %s746_s19 = sadd.s32 4294967294, %s1051_s17  }
   0xd   : > { %p56_p0 = scmp.ne.s32.totalorder %s1035_s13, %s1031_s12  ;;  %p57_p1 = scmp.eq.s32.totalorder %s1114_s18, 0 }
   0xe   : > { %p141_p3 = scmp.eq.s32.totalorder %s746_s19, 1  ;;  %p747_p5 = scmp.ge.s32.totalorder %s1051_s17, 1 }
   0xf   : > { %p1123_p4 = por %p57_p1, %p56_p0  ;;  %p148_p7 = scmp.lt.s32.totalorder %s1051_s17, 3 }
  0x10   : > { %p1128_p6 = por %p141_p3, %p56_p0  ;;  %s1053_s23 = smov [#allocation8]  }
  0x11   : > { %p1133_p8 = pnand %p747_p5, %p148_p7  ;;  %s160_s24 = sshll.u32 %s1053_s23, 4  ;;  %s161_s24 = int_to_ptr.vmem [resolvable:$true] %s160_s24 }
  0x12   : > { %s1414_s21 = scalar_select %p1128_p6, 1, 0 }
  0x13   : > { %p806_p9 = pneg %p1133_p8  ;;  %p749_p10 = scmp.ge.s32.totalorder %s1051_s17, 2 }
  0x14   : > { %s34_s26 = sadd.s32 1, %s1047_s16  ;;  %s891_s27 = scalar_lea.vmem %s161_s24, 3072 }
  0x15   : > { %p1142_p11 = pnand %p806_p9, %p57_p1  ;;  %p892_p13 = scmp.ne.s32.totalorder %s161_s24, %s891_s27 }
  0x16   : > { %p899_p5 = scmp.lt.s32.totalorder %s161_s24, %s161_s24  ;;  %p900_p7 = scmp.lt.s32.totalorder %s891_s27, %s891_s27 }
  0x17   : > { %p882_p12 = pneg %p1142_p11 }
  0x18   : > { %p901_p2 = por %p900_p7, %p899_p5 }
  0x19   : > { %p894_p0 = pnand %p892_p13, %p882_p12 }
  0x1b   : > { %p895_p3 = pneg %p894_p0 }
  0x1d   : > { %p902_p6 = pnand %p901_p2, %p895_p3 }
  0x1f   : > { %905 = shalt.err (!%p902_p6)
}
  0x20   : > { %s1054_s28 = smov 256   ;;  %s1055_s29 = smov 16  }
  0x21   : > { %s1417_s2 = sld [smem:[#allocation19_spill]]  ;;  %p36_p2 = scmp.ge.s32.totalorder %s34_s26, 2 }
  0x22   : > { %s43_s5 = sadd.s32 1, %s1039_s14  ;;  %p50_p6 = scmp.ne.s32.totalorder %s1039_s14, %s1035_s13 }
  0x23   : > { %p51_p9 = scmp.eq.s32.totalorder %s1051_s17, 0  ;;  %s1434_s26 = smov (%p36_p2, %s34_s26), 0 }
  0x24   : > { %1418 = sst [smem:[#allocation16_spill]] %s1434_s26  ;;  %p1419_p13 = scmp.eq.s32.totalorder %s1114_s18, 1 }
  0x25   : > { %p52_p12 = por %p51_p9, %p50_p6  ;;  %s38_s7 = ssub.s32 %s1047_s16, %s1434_s26 }
  0x26   : > { %p1162_p0 = por %p1419_p13, %p50_p6  ;;  %p822_p3 = scmp.lt.s32.totalorder %s1051_s17, 2 }
  0x27   : > { %809 = dma.hbm_to_vmem [thread:$0]  (!%p1142_p11), %s1417_s2, 3072, %s161_s24, [#allocation7], %s1054_s28, %s1054_s28, %s1055_s29  }
  0x28   : > { %p41_p5 = scmp.eq.s32.totalorder %s38_s7, 0  ;;  %s1170_s8 = sand.u32 1, %s1039_s14  }
  0x29   : > { %s750_s9 = sshll.u32 %s1170_s8, 7  ;;  %s793_s11 = smul.u32 2176, %s1047_s16 }
  0x2a   : > { %s1174_s10 = scalar_select %p41_p5, %s1039_s14, %s43_s5  }
  0x2b   : > { %s178_s19 = scalar_lea.vmem [#allocation3], %s750_s9  ;;  %p1177_p11 = pnand %p822_p3, %p52_p12 }
  0x2c   : > { %1421 = sst [smem:[#allocation17_spill]] %s1174_s10  ;;  %s193_s23 = sshll.u32 %s178_s19, 4  ;;  %s194_s23 = int_to_ptr.vmem [resolvable:$true] %s193_s23 }
  0x2d   : > { %s1423_s0 = sld [smem:[#allocation18_spill]]  ;;  %s203_s29 = sand.u32 1, %s1051_s17  }
  0x2e   : > { %s175_s30 = scalar_lea.sflag [#allocation4], %s1170_s8  ;;  %p908_p7 = pneg %p1177_p11 }
  0x2f   : > { %s919_s4 = scalar_lea.vmem %s194_s23, 2048  ;;  %s1056_s5 = smov [#allocation3]  }
  0x30   : > { %p920_p2 = scmp.ne.s32.totalorder %s194_s23, %s919_s4  ;;  %s924_s7 = sshll.u32 %s1056_s5, 4  ;;  %s925_s7 = int_to_ptr.vmem [resolvable:$false] %s924_s7 }
  0x31   : > { %s926_s9 = scalar_lea.vmem %s925_s7, 4096  ;;  %p927_p12 = scmp.lt.s32.totalorder %s194_s23, %s925_s7 }
  0x32   : > { %p922_p6 = pnand %p920_p2, %p908_p7  ;;  %p928_p13 = scmp.lt.s32.totalorder %s926_s9, %s919_s4 }
  0x33   : > { %s191_s28 = scalar_lea.hbm %s1423_s0, %s793_s11 }
  0x34   : > { %p923_p9 = pneg %p922_p6  ;;  %p929_p3 = por %p928_p13, %p927_p12 }
  0x36   : > { %p930_p5 = pnand %p929_p3, %p923_p9 }
  0x38   : > { %933 = shalt.err (!%p930_p5)
}
  0x39   : > { %s1057_s19 = smov 128   ;;  %s1058_s25 = smov 8  }
  0x3a   : > { %813 = dma.hbm_to_vmem [thread:$0]  (!%p1177_p11), %s191_s28, 2048, %s194_s23, %s175_s30, %s1057_s19, %s1057_s19, %s1058_s25  }
  0x3b   : > { %s752_s27 = sshll.u32 %s1170_s8, 3  ;;  %s668_s5 = scalar_lea.hbm %s1402_s1, %s793_s11 }
  0x3c   : > { %s669_s26 = scalar_lea.hbm %s668_s5, 2048  ;;  %s207_s7 = scalar_lea.vmem [#allocation6], %s752_s27 }
  0x3d   : > { %s218_s4 = sshll.u32 %s207_s7, 4  ;;  %s204_s9 = scalar_lea.sflag [#allocation7], %s203_s29  ;;  %s219_s4 = int_to_ptr.vmem [resolvable:$true] %s218_s4 }
  0x3e   : > { %s947_s10 = scalar_lea.vmem %s219_s4, 128  ;;  %s1059_s14 = smov [#allocation6]  }
  0x3f   : > { %p948_p2 = scmp.ne.s32.totalorder %s219_s4, %s947_s10  ;;  %s952_s17 = sshll.u32 %s1059_s14, 4  ;;  %s953_s17 = int_to_ptr.vmem [resolvable:$false] %s952_s17 }
  0x40   : > { %s954_s8 = scalar_lea.vmem %s953_s17, 256  ;;  %p955_p12 = scmp.lt.s32.totalorder %s219_s4, %s953_s17 }
  0x41   : > { %p950_p6 = pnand %p948_p2, %p908_p7  ;;  %p956_p13 = scmp.lt.s32.totalorder %s954_s8, %s947_s10 }
  0x43   : > { %p951_p9 = pneg %p950_p6  ;;  %p957_p3 = por %p956_p13, %p955_p12 }
  0x45   : > { %p958_p5 = pnand %p957_p3, %p951_p9 }
  0x47   : > { %961 = shalt.err (!%p958_p5)
}
  0x48   : > { %816 = dma.hbm_to_vmem [thread:$0]  (!%p1177_p11), %s669_s26, 128, %s219_s4, %s204_s9  }
  0x49   : > { %227 = sbr.rel (%p1133_p8) target bundleno = 388 (0x184), region = 32  ;;  %s1209_s0 = sand.u32 (!%p1133_p8), 1, %s1035_s13  }
  0x4a   : > { %s755_s2 = sshll.u32 (!%p1133_p8), %s1209_s0, 7  ;;  %s230_s14 = scalar_lea.sflag (!%p1133_p8), [#allocation4], %s1209_s0 }
  0x4b   : > { %s1213_s11 = scalar_lea.vmem (!%p1133_p8), [#allocation3], %s755_s2 }
  0x4e   : > { %1014 = dma.done.wait (%p1123_p4), %s230_s14, 2048  }
  0x4f   : > { %1016 = vsyncadd (%p1123_p4), %s230_s14, 4294965248  ;;  %s238_s17 = sand.u32 1, %s1114_s18   ;;  %s756_s22 = sshll.u32 %s1209_s0, 3 }
  0x50   : > { %s239_s26 = scalar_lea.sflag [#allocation7], %s238_s17  ;;  %s242_s10 = scalar_lea.vmem [#allocation6], %s756_s22 }
  0x51   : > { %1018 = dma.done.wait (%p1123_p4), %s239_s26, 128  }
  0x52   : > { %1020 = vsyncadd (%p1123_p4), %s239_s26, 4294967168 }
  0x53   : > { %1022 = dma.done.wait (%p57_p1), [#allocation7], 3072  }
  0x54   : > { %1024 = vsyncadd (%p57_p1), [#allocation7], 4294964224  ;;  %v296_v0 = vld [vmem:[%s1213_s11 + $0x78] sm:$0xff]  ;;  %v313_v1 = vld [vmem:[%s242_s10] sm:$0xff]  ;;  %vm349_vm0 = vcmask 1046528   ;;  %s794_s18 = smul.u32 96, %s1209_s0 }
  0x55   : > { %v1231_v2 = vld [vmem:[%s1213_s11 + $0x70] sm:$0xff]  ;;  %314 = vst [vmem:[#allocation2 + $0x80] sm:$0xff] %v313_v1  ;;  %v379_v3 = vrot.slane %v296_v0, 1  ;;  %v294_v5 = vld [vmem:[%s1213_s11 + $0x68] sm:$0xff]  ;;  %v1236_v6 = vld [vmem:[%s1213_s11 + $0x60] sm:$0xff]  ;;  %s795_s23 = smul.u32 1536, %s1043_s15 }
  0x56   : > { %v377_v4 = vrot.slane %v1231_v2, 1  ;;  %v1239_v7 = vld [vmem:[%s1213_s11 + $0x58] sm:$0xff]  ;;  %v375_v8 = vrot.slane %v294_v5, 1  ;;  %v373_v9 = vrot.slane %v1236_v6, 1  ;;  %v1244_v11 = vld [vmem:[%s1213_s11 + $0x50] sm:$0xff]  ;;  %v1247_v12 = vld [vmem:[%s1213_s11 + $0x48] sm:$0xff] }
  0x57   : > { %v371_v10 = vrot.slane %v1239_v7, 1  ;;  %v1250_v13 = vld [vmem:[%s1213_s11 + $0x40] sm:$0xff]  ;;  %v369_v15 = vrot.slane %v1244_v11, 1  ;;  %v367_v16 = vrot.slane %v1247_v12, 1  ;;  %v1257_v18 = vld [vmem:[%s1213_s11 + $0x38] sm:$0xff]  ;;  %v1260_v19 = vld [vmem:[%s1213_s11 + $0x30] sm:$0xff]  ;;  %s1349_s30 = scalar_lea.hbm %s1404_s3, %s795_s23 }
  0x58   : > { %v380_v14 = vsel %vm349_vm0, %v377_v4, %v379_v3  ;;  %v365_v17 = vrot.slane %v1250_v13, 1  ;;  %v1263_v20 = vld [vmem:[%s1213_s11 + $0x28] sm:$0xff]  ;;  %v378_v21 = vsel %vm349_vm0, %v375_v8, %v377_v4  ;;  %v376_v22 = vsel %vm349_vm0, %v373_v9, %v375_v8  ;;  %v1270_v25 = vld [vmem:[%s1213_s11 + $0x20] sm:$0xff]  ;;  %v1273_v26 = vld [vmem:[%s1213_s11 + $0x18] sm:$0xff]  ;;  %s1332_s20 = scalar_lea.vmem [#allocation9], %s794_s18  ;;  %s609_s15 = scalar_lea.sflag [#allocation5], %s1209_s0 }
  0x59   : > { %v374_v23 = vsel %vm349_vm0, %v371_v10, %v373_v9  ;;  %v363_v24 = vrot.slane %v1257_v18, 1  ;;  %v1276_v27 = vld [vmem:[%s1213_s11 + $0x10] sm:$0xff]  ;;  %v372_v28 = vsel %vm349_vm0, %v369_v15, %v371_v10  ;;  %v370_v29 = vsel %vm349_vm0, %v367_v16, %v369_v15  ;;  %v1283_v32 = vld [vmem:[%s1213_s11 + $0x8] sm:$0xff]  ;;  %v1286_v33 = vld [vmem:[%s1213_s11] sm:$0xff]  ;;  %s623_s24 = sshll.u32 %s1332_s20, 4  ;;  %s1060_s25 = smov [#allocation9]   ;;  %s1351_s24 = int_to_ptr.vmem [resolvable:$true] %s623_s24 }
  0x5a   : > { %v368_v30 = vsel %vm349_vm0, %v365_v17, %v367_v16  ;;  %v361_v31 = vrot.slane %v1260_v19, 1  ;;  %v416_v34 = vld [vmem:[#allocation8 + $0x8] sm:$0xff]  ;;  %v359_v36 = vrot.slane %v1263_v20, 1  ;;  %v357_v37 = vrot.slane %v1270_v25, 1  ;;  %297 = vst [vmem:[#allocation2 + $0x58] sm:$0xff] %v1286_v33  ;;  %v415_v54 = vld [vmem:[#allocation8] sm:$0xff] }
  0x5b   : > { %v366_v35 = vsel %vm349_vm0, %v363_v24, %v365_v17  ;;  %v355_v38 = vrot.slane %v1273_v26, 1  ;;  %535 = vmatprep.mubr.f32.mxu0 %v416_v34  ;;  %v428_v39 = vld [vmem:[#allocation8 + $0x68] sm:$0xff]  ;;  %v353_v41 = vrot.slane %v1276_v27, 1  ;;  %v351_v42 = vrot.slane %v1283_v32, 1  ;;  %v427_v55 = vld [vmem:[#allocation8 + $0x60] sm:$0xff]  ;;  %v418_v56 = vld [vmem:[#allocation8 + $0x18] sm:$0xff] }
  0x5c   : > { %v364_v40 = vsel %vm349_vm0, %v361_v31, %v363_v24  ;;  %565 = vmatprep.mubr.f32.mxu1 %v428_v39  ;;  %v331_v43 = vld [vmem:[#allocation2 + $0x80] sm:$0x1]  ;;  %v362_v44 = vsel %vm349_vm0, %v359_v36, %v361_v31  ;;  %v360_v45 = vsel %vm349_vm0, %v357_v37, %v359_v36  ;;  %v430_v57 = vld [vmem:[#allocation8 + $0x78] sm:$0xff]  ;;  %v417_v58 = vld [vmem:[#allocation8 + $0x10] sm:$0xff]  ;;  %s963_s19 = scalar_lea.vmem %s1351_s24, 1536  ;;  %s967_s27 = sshll.u32 %s1060_s25, 4  ;;  %s968_s27 = int_to_ptr.vmem [resolvable:$false] %s967_s27 }
  0x5d   : > { %v358_v46 = vsel %vm349_vm0, %v355_v38, %v357_v37  ;;  %v381_v47 = vrot.slane %v331_v43, 1  ;;  %v356_v48 = vsel %vm349_vm0, %v353_v41, %v355_v38  ;;  %v354_v49 = vsel %vm349_vm0, %v351_v42, %v353_v41  ;;  %v429_v59 = vld [vmem:[#allocation8 + $0x70] sm:$0xff]  ;;  %v420_v60 = vld [vmem:[#allocation8 + $0x28] sm:$0xff]  ;;  %v419_v62 = vld [vmem:[#allocation8 + $0x20] sm:$0xff]  ;;  %p964_p1 = scmp.ne.s32.totalorder %s1351_s24, %s963_s19  ;;  %s969_s5 = scalar_lea.vmem %s968_s27, 3072 }
  0x5e   : > { %v432_v61 = vld [vmem:[#allocation8 + $0x88] sm:$0xff]  ;;  %v431_v63 = vld [vmem:[#allocation8 + $0x80] sm:$0xff]  ;;  %v434_v1 = vld [vmem:[#allocation8 + $0x98] sm:$0xff]  ;;  %p970_p11 = scmp.lt.s32.totalorder %s1351_s24, %s968_s27  ;;  %p971_p7 = scmp.lt.s32.totalorder %s969_s5, %s963_s19 }
  0x5f   : > { %v382_v50 = vsel %vm349_vm0, %v379_v3, %v381_v47  ;;  %v433_v3 = vld [vmem:[#allocation8 + $0x90] sm:$0xff]  ;;  %v424_v4 = vld [vmem:[#allocation8 + $0x48] sm:$0xff]  ;;  %v426_v8 = vld [vmem:[#allocation8 + $0x58] sm:$0xff]  ;;  %p965_p4 = pnand %p964_p1, %p1162_p0 }
  0x60   : > { %471 = vmatprep.subr.mxu0 %v382_v50  ;;  %761 = vmatprep.subr.mxu1 %v382_v50  ;;  %v438_v9 = vld [vmem:[#allocation8 + $0xb8] sm:$0xff]  ;;  %v425_v10 = vld [vmem:[#allocation8 + $0x50] sm:$0xff]  ;;  %p972_p2 = por %p971_p7, %p970_p11 }
  0x61   : > { %472 = vmatpush1.xpose.msra.mxu0 %v296_v0  ;;  %777 = vmatpush1.xpose.msra.mxu1 %v296_v0  ;;  %v315_v51 = vld [vmem:[#allocation2 + $0x58] sm:$0xfe]  ;;  %p966_p8 = pneg %p965_p4 }
  0x62   : > { %473 = vmatprep.subr.mxu0 %v380_v14  ;;  %762 = vmatprep.subr.mxu1 %v380_v14  ;;  %v350_v52 = vrot.slane %v315_v51, 1  ;;  %v422_v0 = vld [vmem:[#allocation8 + $0x38] sm:$0xff] }
  0x63   : > { %p973_p6 = pnand %p972_p2, %p966_p8 }
  0x64   : > { %v352_v53 = vsel %vm349_vm0, %v350_v52, %v351_v42 }
  0x65   : > { %474 = vmatpush1.xpose.msra.mxu0 %v1231_v2  ;;  %778 = vmatpush1.xpose.msra.mxu1 %v1231_v2  ;;  %v421_v2 = vld [vmem:[#allocation8 + $0x30] sm:$0xff] }
  0x66   : > { %475 = vmatprep.subr.mxu0 %v378_v21  ;;  %763 = vmatprep.subr.mxu1 %v378_v21 }
  0x69   : > { %476 = vmatpush1.xpose.msra.mxu0 %v294_v5  ;;  %779 = vmatpush1.xpose.msra.mxu1 %v294_v5  ;;  %v436_v5 = vld [vmem:[#allocation8 + $0xa8] sm:$0xff] }
  0x6a   : > { %477 = vmatprep.subr.mxu0 %v376_v22  ;;  %764 = vmatprep.subr.mxu1 %v376_v22 }
  0x6d   : > { %478 = vmatpush1.xpose.msra.mxu0 %v1236_v6  ;;  %780 = vmatpush1.xpose.msra.mxu1 %v1236_v6  ;;  %v423_v6 = vld [vmem:[#allocation8 + $0x40] sm:$0xff] }
  0x6e   : > { %479 = vmatprep.subr.mxu0 %v374_v23  ;;  %765 = vmatprep.subr.mxu1 %v374_v23 }
  0x71   : > { %480 = vmatpush1.xpose.msra.mxu0 %v1239_v7  ;;  %781 = vmatpush1.xpose.msra.mxu1 %v1239_v7  ;;  %v435_v7 = vld [vmem:[#allocation8 + $0xa0] sm:$0xff] }
  0x72   : > { %481 = vmatprep.subr.mxu0 %v372_v28  ;;  %766 = vmatprep.subr.mxu1 %v372_v28 }
  0x75   : > { %482 = vmatpush1.xpose.msra.mxu0 %v1244_v11  ;;  %782 = vmatpush1.xpose.msra.mxu1 %v1244_v11  ;;  %v437_v11 = vld [vmem:[#allocation8 + $0xb0] sm:$0xff] }
  0x76   : > { %483 = vmatprep.subr.mxu0 %v370_v29  ;;  %767 = vmatprep.subr.mxu1 %v370_v29 }
  0x79   : > { %484 = vmatpush1.xpose.msra.mxu0 %v1247_v12  ;;  %783 = vmatpush1.xpose.msra.mxu1 %v1247_v12 }
  0x7a   : > { %485 = vmatprep.subr.mxu0 %v368_v30  ;;  %768 = vmatprep.subr.mxu1 %v368_v30 }
  0x7d   : > { %486 = vmatpush1.xpose.msra.mxu0 %v1250_v13  ;;  %784 = vmatpush1.xpose.msra.mxu1 %v1250_v13 }
  0x7e   : > { %487 = vmatprep.subr.mxu0 %v366_v35  ;;  %769 = vmatprep.subr.mxu1 %v366_v35 }
  0x81   : > { %488 = vmatpush1.xpose.msra.mxu0 %v1257_v18  ;;  %785 = vmatpush1.xpose.msra.mxu1 %v1257_v18 }
  0x82   : > { %489 = vmatprep.subr.mxu0 %v364_v40  ;;  %770 = vmatprep.subr.mxu1 %v364_v40 }
  0x85   : > { %490 = vmatpush1.xpose.msra.mxu0 %v1260_v19  ;;  %786 = vmatpush1.xpose.msra.mxu1 %v1260_v19 }
  0x86   : > { %491 = vmatprep.subr.mxu0 %v362_v44  ;;  %771 = vmatprep.subr.mxu1 %v362_v44 }
  0x89   : > { %492 = vmatpush1.xpose.msra.mxu0 %v1263_v20  ;;  %787 = vmatpush1.xpose.msra.mxu1 %v1263_v20 }
  0x8a   : > { %493 = vmatprep.subr.mxu0 %v360_v45  ;;  %772 = vmatprep.subr.mxu1 %v360_v45 }
  0x8d   : > { %494 = vmatpush1.xpose.msra.mxu0 %v1270_v25  ;;  %788 = vmatpush1.xpose.msra.mxu1 %v1270_v25 }
  0x8e   : > { %495 = vmatprep.subr.mxu0 %v358_v46  ;;  %773 = vmatprep.subr.mxu1 %v358_v46 }
  0x91   : > { %496 = vmatpush1.xpose.msra.mxu0 %v1273_v26  ;;  %789 = vmatpush1.xpose.msra.mxu1 %v1273_v26 }
  0x92   : > { %497 = vmatprep.subr.mxu0 %v356_v48  ;;  %774 = vmatprep.subr.mxu1 %v356_v48 }
  0x95   : > { %498 = vmatpush1.xpose.msra.mxu0 %v1276_v27  ;;  %790 = vmatpush1.xpose.msra.mxu1 %v1276_v27 }
  0x96   : > { %499 = vmatprep.subr.mxu0 %v354_v49  ;;  %775 = vmatprep.subr.mxu1 %v354_v49 }
  0x99   : > { %500 = vmatpush1.xpose.msra.mxu0 %v1283_v32  ;;  %791 = vmatpush1.xpose.msra.mxu1 %v1283_v32 }
  0x9a   : > { %501 = vmatprep.subr.mxu0 %v352_v53  ;;  %776 = vmatprep.subr.mxu1 %v352_v53 }
  0x9d   : > { %502 = vmatpush1.xpose.msra.mxu0 %v1286_v33  ;;  %792 = vmatpush1.xpose.msra.mxu1 %v1286_v33 }
  0xa0   : > { %536 = vmatmul.mubr.f32.vlgmr.msra.gmra.mxu0 %v415_v54  ;;  %566 = vmatmul.mubr.f32.vlgmr.msra.gmra.mxu1 %v427_v55 }
  0xa1   : > { %540 = vmatprep.mubr.f32.mxu0 %v418_v56  ;;  %570 = vmatprep.mubr.f32.mxu1 %v430_v57 }
  0xa4   : > { %541 = vmatmul.mubr.f32.gmra.mxu0 %v417_v58  ;;  %571 = vmatmul.mubr.f32.gmra.mxu1 %v429_v59 }
  0xa5   : > { %545 = vmatprep.mubr.f32.mxu0 %v420_v60  ;;  %575 = vmatprep.mubr.f32.mxu1 %v432_v61 }
  0xa8   : > { %546 = vmatmul.mubr.f32.gmra.mxu0 %v419_v62  ;;  %576 = vmatmul.mubr.f32.gmra.mxu1 %v431_v63 }
  0xa9   : > { %550 = vmatprep.mubr.f32.mxu0 %v422_v0  ;;  %580 = vmatprep.mubr.f32.mxu1 %v434_v1 }
  0xac   : > { %551 = vmatmul.mubr.f32.gmra.mxu0 %v421_v2  ;;  %581 = vmatmul.mubr.f32.gmra.mxu1 %v433_v3 }
  0xad   : > { %555 = vmatprep.mubr.f32.mxu0 %v424_v4  ;;  %585 = vmatprep.mubr.f32.mxu1 %v436_v5 }
  0xb0   : > { %556 = vmatmul.mubr.f32.gmra.mxu0 %v423_v6  ;;  %586 = vmatmul.mubr.f32.gmra.mxu1 %v435_v7 }
  0xb1   : > { %560 = vmatprep.mubr.f32.mxu0 %v426_v8  ;;  %590 = vmatprep.mubr.f32.mxu1 %v438_v9 }
  0xb4   : > { %561 = vmatmul.mubr.f32.gmra.mxu0 %v425_v10  ;;  %591 = vmatmul.mubr.f32.gmra.mxu1 %v437_v11 }
 0x160   : > { %v537_v12 = vpop.f32.mrf.mxu0  ;;  %v567_v13 = vpop.f32.mrf.mxu1 }
 0x161   : > { %596 = vst [vmem:[%s1332_s20] sm:$0xff] %v537_v12  ;;  %602 = vst [vmem:[%s1332_s20 + $0x30] sm:$0xff] %v567_v13 }
 0x162   : > { %v539_v14 = vpop.f32.mrf.mxu0  ;;  %v569_v15 = vpop.f32.mrf.mxu1 }
 0x164   : > { %v542_v16 = vpop.f32.mrf.mxu0  ;;  %v572_v17 = vpop.f32.mrf.mxu1 }
 0x165   : > { %597 = vst [vmem:[%s1332_s20 + $0x8] sm:$0xff] %v542_v16  ;;  %603 = vst [vmem:[%s1332_s20 + $0x38] sm:$0xff] %v572_v17 }
 0x166   : > { %v544_v18 = vpop.f32.mrf.mxu0  ;;  %v574_v19 = vpop.f32.mrf.mxu1 }
 0x168   : > { %v547_v20 = vpop.f32.mrf.mxu0  ;;  %v577_v21 = vpop.f32.mrf.mxu1 }
 0x169   : > { %598 = vst [vmem:[%s1332_s20 + $0x10] sm:$0xff] %v547_v20  ;;  %604 = vst [vmem:[%s1332_s20 + $0x40] sm:$0xff] %v577_v21 }
 0x16a   : > { %v549_v22 = vpop.f32.mrf.mxu0  ;;  %v579_v23 = vpop.f32.mrf.mxu1 }
 0x16c   : > { %v552_v24 = vpop.f32.mrf.mxu0  ;;  %v582_v25 = vpop.f32.mrf.mxu1 }
 0x16d   : > { %599 = vst [vmem:[%s1332_s20 + $0x18] sm:$0xff] %v552_v24  ;;  %605 = vst [vmem:[%s1332_s20 + $0x48] sm:$0xff] %v582_v25 }
 0x16e   : > { %v554_v26 = vpop.f32.mrf.mxu0  ;;  %v584_v27 = vpop.f32.mrf.mxu1 }
 0x170   : > { %v557_v28 = vpop.f32.mrf.mxu0  ;;  %v587_v29 = vpop.f32.mrf.mxu1 }
 0x171   : > { %600 = vst [vmem:[%s1332_s20 + $0x20] sm:$0xff] %v557_v28  ;;  %606 = vst [vmem:[%s1332_s20 + $0x50] sm:$0xff] %v587_v29 }
 0x172   : > { %v559_v30 = vpop.f32.mrf.mxu0  ;;  %v589_v31 = vpop.f32.mrf.mxu1 }
 0x174   : > { %v562_v32 = vpop.f32.mrf.mxu0  ;;  %v592_v33 = vpop.f32.mrf.mxu1 }
 0x175   : > { %601 = vst [vmem:[%s1332_s20 + $0x28] sm:$0xff] %v562_v32  ;;  %607 = vst [vmem:[%s1332_s20 + $0x58] sm:$0xff] %v592_v33 }
 0x176   : > { %v564_v34 = vpop.f32.mrf.mxu0  ;;  %v594_v35 = vpop.f32.mrf.mxu1 }
 0x177   : > { %976 = shalt.err (!%p973_p6)
}
 0x178   : > { %s977_s7 = scalar_lea.hbm %s1349_s30, 1536  ;;  %s981_s8 = scalar_lea.hbm %s1404_s3, 3072 }
 0x179   : > { %p978_p9 = scmp.ne.s32.totalorder %s1349_s30, %s977_s7  ;;  %p982_p3 = scmp.lt.s32.totalorder %s1349_s30, %s1404_s3 }
 0x17a   : > { %p983_p5 = scmp.lt.s32.totalorder %s981_s8, %s977_s7 }
 0x17b   : > { %p979_p12 = pnand %p978_p9, %p1162_p0 }
 0x17c   : > { %p984_p1 = por %p983_p5, %p982_p3 }
 0x17d   : > { %p980_p13 = pneg %p979_p12 }
 0x17f   : > { %p985_p4 = pnand %p984_p1, %p980_p13 }
 0x181   : > { %988 = shalt.err (!%p985_p4)
}
 0x182   : > { %s1061_s11 = smov 128   ;;  %s1062_s17 = smov 8  }
 0x183   : > { %804 = dma.vmem_to_hbm [thread:$0]  (%p1162_p0), %s1351_s24, 1536, %s1349_s30, %s609_s15, %s1061_s11, %s1061_s11, %s1062_s17  }
 0x184 PF: > { %s1424_s22 = sld [smem:[#allocation15_spill]]  ;;  %s638_s26 = sand.u32 1, %s1031_s12  }
 0x185   : > { %p1425_p8 = scmp.ne.s32.totalorder %s1414_s21, 0  ;;  %s639_s10 = scalar_lea.sflag [#allocation5], %s638_s26 }
 0x187   : > { %p818_p11 = pnand %p749_p10, %p1425_p8 }
 0x189   : > { %p819_p7 = pneg %p818_p11 }
 0x18b   : > { %1026 = dma.done.wait (%p819_p7), %s639_s10, 1536  }
 0x18c   : > { %1028 = vsyncadd (%p819_p7), %s639_s10, 4294965760  ;;  %s22_s17 = sadd.s32 1, %s1424_s22   ;;  %s1426_s18 = sld [smem:[#allocation14_spill]] }
 0x18d   : > { %p19_p2 = scmp.ge.s32.totalorder %s22_s17, 4   ;;  %s1427_s14 = sld [smem:[#allocation17_spill]] }
 0x18e   : > { %s1428_s6 = sld [smem:[#allocation16_spill]]  ;;  %s1429_s12 = smov %s1035_s13 }
 0x18f   : > { %s1431_s15 = smov %s1047_s16 }
 0x190   :  { %21 = sbr.rel (!%p19_p2) target bundleno = 11 (0xb), region = 94 }
 0x192   : > { %s1430_s13 = smov %s1426_s18 }
 0x194   : > { %s1432_s16 = smov %s1428_s6 }
 0x195   :  { %644 = vsyncpa [#allocation4], 1 }
 0x196   :  { %646 = vsyncpa [#allocation4 + $0x1], 1 }
 0x197   :  { %647 = vsyncpa [#allocation7], 1 }
 0x198   :  { %649 = vsyncpa [#allocation7 + $0x1], 1 }
 0x199   :  { %650 = vsyncpa [#allocation5], 1 }
 0x19a   :  { %652 = vsyncpa [#allocation5 + $0x1], 1 }

</bundles_post_ra>
